<compile_context>
chip_gen: v5e
topology: v5e:2x2
jax: 0.10.0
libtpu: 0.0.40
codegen_flags: <defaults>
</compile_context>

<pallas_src>
import functools

import jax
import jax.numpy as jnp
from jax.experimental import pallas as pl
from jax.experimental.pallas import tpu as pltpu


def _label_smoothing_kernel(logits_ref, label_ref, out_ref, *, smoothing):
    x = logits_ref[...].astype(jnp.float32)                 # (TR, C)
    lbl = label_ref[...]                                     # (TR, 1) int32
    C = x.shape[-1]

    # Numerically-stable logsumexp along the class (lane) axis.
    m = jnp.max(x, axis=-1, keepdims=True)
    lse = jnp.log(jnp.sum(jnp.exp(x - m), axis=-1, keepdims=True)) + m

    # x[label] via a masked lane-sum; sum(x) for the uniform smoothing term.
    class_ids = jax.lax.broadcasted_iota(jnp.int32, x.shape, 1)
    x_label = jnp.sum(jnp.where(class_ids == lbl, x, 0.0),
                      axis=-1, keepdims=True)
    x_sum = jnp.sum(x, axis=-1, keepdims=True)

    # row_loss = -sum(log_softmax(x) * smooth)
    #          = lse - ((1-s) * x[label] + (s/C) * sum(x))
    out_ref[...] = lse - ((1.0 - smoothing) * x_label
                          + (smoothing / C) * x_sum)


def _choose_tile_rows(n_rows, n_classes, itemsize):
    """Largest row tile whose double-buffered logits block fits a conservative
    VMEM budget (sized with v7x's 64 MiB physical VMEM as the worst case)."""
    per_buffer_budget = 12 * 1024 * 1024       # bytes for ONE logits buffer
    tr = per_buffer_budget // max(1, n_classes * itemsize)
    tr = max(8, min(2048, tr))
    tr = (tr // 8) * 8                          # keep a sublane multiple
    n_pad8 = ((n_rows + 7) // 8) * 8
    return max(8, min(tr, n_pad8))


def label_smoothing_loss(logits, label, *, smoothing=0.1, reduction="mean",
                         tile_rows=None):
    """logits: (N, C) float32/bfloat16; label: (N,) int class indices.

    Implements the default-config path of the PyTorch module
    (ignore_index=-1 => no row filtering is performed).
    """
    # TODO(synk): ignore_index != -1 branches (data-dependent row filtering /
    # the 'label==2' masking path) are not implemented; unreachable for the
    # default configuration.
    N, C = logits.shape
    label2d = label.astype(jnp.int32).reshape(N, 1)

    if tile_rows is None:
        tile_rows = _choose_tile_rows(N, C, jnp.dtype(logits.dtype).itemsize)

    n_blocks = pl.cdiv(N, tile_rows)
    n_pad = n_blocks * tile_rows
    if n_pad != N:
        # Padded rows produce finite junk losses; they are sliced off below.
        logits = jnp.pad(logits, ((0, n_pad - N), (0, 0)))
        label2d = jnp.pad(label2d, ((0, n_pad - N), (0, 0)))

    kernel = functools.partial(_label_smoothing_kernel,
                               smoothing=float(smoothing))

    per_row = pl.pallas_call(
        kernel,
        out_shape=jax.ShapeDtypeStruct((n_pad, 1), jnp.float32),
        grid_spec=pltpu.PrefetchScalarGridSpec(
            num_scalar_prefetch=0,
            grid=(n_blocks,),
            in_specs=[
                pl.BlockSpec((tile_rows, C), lambda i: (i, 0)),
                pl.BlockSpec((tile_rows, 1), lambda i: (i, 0)),
            ],
            out_specs=pl.BlockSpec((tile_rows, 1), lambda i: (i, 0)),
        ),
        compiler_params=pltpu.CompilerParams(
            dimension_semantics=("parallel",),      # independent blocks -> megacore OK
            vmem_limit_bytes=48 * 1024 * 1024,
        ),
    )(logits, label2d)

    per_row = per_row[:N, 0]
    if reduction == "mean":
        return jnp.mean(per_row)
    if reduction == "sum":
        return jnp.sum(per_row)
    return per_row                                  # reduction='none'


def _reference(logits, label, smoothing=0.1):
    N, C = logits.shape
    onehot = jax.nn.one_hot(label, C, dtype=jnp.float32)
    smooth = onehot * (1.0 - smoothing) + smoothing / C
    smooth = smooth / jnp.sum(smooth, axis=-1, keepdims=True)
    logs = jax.nn.log_softmax(logits.astype(jnp.float32), axis=-1)
    return jnp.mean(-jnp.sum(logs * smooth, axis=-1))


if __name__ == "__main__":
    key = jax.random.PRNGKey(0)
    k1, k2 = jax.random.split(key)
    N, C = 16, 32
    logits = jax.random.normal(k1, (N, C), dtype=jnp.float32)
    label = jax.random.randint(k2, (N,), 0, C, dtype=jnp.int32)

    loss = label_smoothing_loss(logits, label, smoothing=0.1)
    loss = jax.block_until_ready(loss)

    ref = _reference(logits, label, smoothing=0.1)
    assert jnp.allclose(loss, ref, atol=1e-5, rtol=1e-5), (loss, ref)
    print("KERNEL_OK")
</pallas_src>

<mosaic_0001>
module attributes {stable_mosaic.version = 11 : i64} {
  func.func @_label_smoothing_kernel(%arg0: i32, %arg1: memref<16x32xf32, #tpu.memory_space<vmem>>, %arg2: memref<16x1xi32, #tpu.memory_space<vmem>>, %arg3: memref<16x1xf32, #tpu.memory_space<vmem>>) attributes {dimension_semantics = [#tpu.dimension_semantics<parallel>], iteration_bounds = array<i64: 1>, scalar_prefetch = 0 : i64, scratch_operands = 0 : i64, tpu.core_type = #tpu.core_type<tc>, window_params = [{transform_indices = @transform_0, window_bounds = array<i64: 16, 32>}, {transform_indices = @transform_1, window_bounds = array<i64: 16, 1>}, {transform_indices = @transform_2, window_bounds = array<i64: 16, 1>}]} {
    %c0 = arith.constant 0 : index
    %c0_0 = arith.constant 0 : index
    %0 = vector.load %arg1[%c0, %c0_0] : memref<16x32xf32, #tpu.memory_space<vmem>>, vector<16x32xf32>
    %c0_1 = arith.constant 0 : index
    %c0_2 = arith.constant 0 : index
    %1 = vector.load %arg2[%c0_1, %c0_2] : memref<16x1xi32, #tpu.memory_space<vmem>>, vector<16x1xi32>
    %cst = arith.constant dense<0xFF800000> : vector<16xf32>
    %2 = vector.multi_reduction <maximumf>, %0, %cst [1] : vector<16x32xf32> to vector<16xf32>
    %3 = vector.shape_cast %2 : vector<16xf32> to vector<16x1xf32>
    %4 = vector.broadcast %3 : vector<16x1xf32> to vector<16x32xf32>
    %5 = arith.subf %0, %4 : vector<16x32xf32>
    %6 = math.exp %5 : vector<16x32xf32>
    %cst_3 = arith.constant dense<0.000000e+00> : vector<16xf32>
    %7 = vector.multi_reduction <add>, %6, %cst_3 [1] : vector<16x32xf32> to vector<16xf32>
    %8 = vector.shape_cast %7 : vector<16xf32> to vector<16x1xf32>
    %9 = math.log %8 : vector<16x1xf32>
    %10 = arith.addf %9, %3 : vector<16x1xf32>
    %11 = tpu.iota {dimensions = array<i32: 1>} : vector<16x32xi32>
    %12 = vector.broadcast %1 : vector<16x1xi32> to vector<16x32xi32>
    %13 = arith.cmpi eq, %11, %12 : vector<16x32xi32>
    %cst_4 = arith.constant 0.000000e+00 : f32
    %14 = vector.broadcast %cst_4 : f32 to vector<16x32xf32>
    %15 = arith.select %13, %0, %14 : vector<16x32xi1>, vector<16x32xf32>
    %cst_5 = arith.constant dense<0.000000e+00> : vector<16xf32>
    %16 = vector.multi_reduction <add>, %15, %cst_5 [1] : vector<16x32xf32> to vector<16xf32>
    %17 = vector.shape_cast %16 : vector<16xf32> to vector<16x1xf32>
    %cst_6 = arith.constant dense<0.000000e+00> : vector<16xf32>
    %18 = vector.multi_reduction <add>, %0, %cst_6 [1] : vector<16x32xf32> to vector<16xf32>
    %19 = vector.shape_cast %18 : vector<16xf32> to vector<16x1xf32>
    %cst_7 = arith.constant 0.899999976 : f32
    %20 = vector.broadcast %cst_7 : f32 to vector<16x1xf32>
    %21 = arith.mulf %20, %17 : vector<16x1xf32>
    %cst_8 = arith.constant 3.125000e-03 : f32
    %22 = vector.broadcast %cst_8 : f32 to vector<16x1xf32>
    %23 = arith.mulf %22, %19 : vector<16x1xf32>
    %24 = arith.addf %21, %23 : vector<16x1xf32>
    %25 = arith.subf %10, %24 : vector<16x1xf32>
    %c0_9 = arith.constant 0 : index
    %c0_10 = arith.constant 0 : index
    %26 = vector.load %arg3[%c0_9, %c0_10] : memref<16x1xf32, #tpu.memory_space<vmem>>, vector<16x1xf32>
    tpu.vector_store %arg3[%c0_9, %c0_10], %25 {strides = array<i32>} : memref<16x1xf32, #tpu.memory_space<vmem>>, vector<16x1xf32>,
    return
  }
  func.func @transform_0(%arg0: i32) -> (i32, i32) {
    %c0_i32 = arith.constant 0 : i32
    %c0_i32_0 = arith.constant 0 : i32
    return %arg0, %c0_i32 : i32, i32
  }
  func.func @transform_1(%arg0: i32) -> (i32, i32) {
    %c0_i32 = arith.constant 0 : i32
    %c0_i32_0 = arith.constant 0 : i32
    return %arg0, %c0_i32 : i32, i32
  }
  func.func @transform_2(%arg0: i32) -> (i32, i32) {
    %c0_i32 = arith.constant 0 : i32
    %c0_i32_0 = arith.constant 0 : i32
    return %arg0, %c0_i32 : i32, i32
  }
}

</mosaic_0001>

<bundles_post_ra>
// kernel: tpu_custom_call.1
= control target key start
LH: loop header
LB: loop body
LE: loop exit
PB: predicated region body
PF: predicated region fallthrough
CT: control target
= control target key end

     0   :  { %vm15_vm0 = vcmask 261120   ;;  %v90_v1 = vmov 0   ;;  %v40_v7 = vlaneseq  ;;  %vm72_vm3 = vcmask 7168   ;;  %s132_s0 = inlined_call_operand.vmem [shape: f32[16,32], index: 0, kind: input, shape index: {}]   ;;  %s133_s1 = inlined_call_operand.vmem [shape: s32[16,1], index: 1, kind: input, shape index: {}]   ;;  %s134_s2 = inlined_call_operand.vmem [shape: f32[16,1], index: 2, kind: output, shape index: {}]  }
   0x1   :  { %v11_v0 = vld [vmem:[%s132_s0] sm:$0xff]  ;;  %80 = vset.pattern.permute.xlu1 %v90_v1  ;;  %81 = vset.pattern.permute.xlu0 %v90_v1  ;;  %v12_v4 = vld [vmem:[%s132_s0 + $0x8] sm:$0xff] }
   0x2   :  { %v13_v2 = vld [vmem:[%s133_s1] sm:$0xff]  ;;  %v16_v3 = vsel %vm15_vm0, %v11_v0, -inf  ;;  %v14_v5 = vld [vmem:[%s133_s1 + $0x8] sm:$0xff]  ;;  %v19_v6 = vsel %vm15_vm0, %v12_v4, -inf  ;;  %v41_v8 = vand.u32 127, %v40_v7  ;;  %v61_v16 = vsel %vm15_vm0, %v12_v4, 0.0 }
   0x3   :  { %43 = vperm.xlu1 %80, %v13_v2   ;;  %17 = vmax.xlane.f32.xlu0 %v16_v3  ;;  %v58_v26 = vsel %vm15_vm0, %v11_v0, 0.0 }
   0xb   :  { %46 = vperm.xlu1 %80, %v14_v5   ;;  %20 = vmax.xlane.f32.xlu0 %v19_v6 }
  0x75   :  { %v44_v9 = vpop.permute.xlu1 %43 }
  0x76   :  { %vm48_vm1 = vcmp.eq.s32.totalorder %v41_v8, %v44_v9  ;;  %v18_v10 = vpop.xlane.xlu0 %17 }
  0x77   :  { %v50_v11 = vsel %vm48_vm1, %v11_v0, 0.0  ;;  %v22_v12 = vsub.f32 %v11_v0, %v18_v10 }
  0x78   :  { %v52_v13 = vsel %vm15_vm0, %v50_v11, 0.0 }
  0x79   :  { %53 = vadd.xlane.f32.xlu0 %v52_v13  ;;  %v24_v14 = vmul.f32 1.442695, %v22_v12 }
  0x7b   :  { %82 = vpow2.f32 %v24_v14 }
  0x7d   :  { %v47_v15 = vpop.permute.xlu1 %46 }
  0x7e   :  { %vm49_vm2 = vcmp.eq.s32.totalorder %v41_v8, %v47_v15  ;;  %v21_v17 = vpop.xlane.xlu0 %20 }
  0x7f   :  { %v51_v18 = vsel %vm49_vm2, %v12_v4, 0.0  ;;  %v23_v19 = vsub.f32 %v12_v4, %v21_v17 }
  0x80   :  { %v55_v20 = vsel %vm15_vm0, %v51_v18, 0.0 }
  0x81   :  { %56 = vadd.xlane.f32.xlu1 %v55_v20  ;;  %62 = vadd.xlane.f32.xlu0 %v61_v16  ;;  %v83_v21 = vpop.eup %82  ;;  %v26_v22 = vmul.f32 1.442695, %v23_v19 }
  0x82   :  { %v28_v23 = vsel %vm15_vm0, %v83_v21, 0.0 }
  0x83   :  { %84 = vpow2.f32 %v26_v22  ;;  %29 = vadd.xlane.f32.xlu2 %v28_v23 }
  0x89   :  { %v85_v24 = vpop.eup %84 }
  0x8a   :  { %v31_v25 = vsel %vm15_vm0, %v85_v24, 0.0 }
  0x8b   :  { %32 = vadd.xlane.f32.xlu2 %v31_v25 }
  0x93   :  { %59 = vadd.xlane.f32.xlu2 %v58_v26 }
  0xec   :  { %v54_v28 = vpop.xlane.xlu0 %53 }
  0xed   :  { %v64_v39 = vmul.f32 0.9, %v54_v28 }
  0xf4   :  { %v57_v30 = vpop.xlane.xlu1 %56  ;;  %v63_v31 = vpop.xlane.xlu0 %62 }
  0xf5   :  { %v65_v33 = vmul.f32 0.9, %v57_v30  ;;  %v67_v34 = vmul.f32 0.003125, %v63_v31 }
  0xf6   :  { %v30_v27 = vpop.xlane.xlu2 %29 }
  0xf7   :  { %86 = vlog2.f32 %v30_v27  ;;  %v69_v42 = vadd.f32 %v67_v34, %v65_v33 }
  0xfd   :  { %v87_v32 = vpop.eup %86 }
  0xfe   :  { %v33_v29 = vpop.xlane.xlu2 %32  ;;  %v35_v36 = vmul.f32 0.6931472, %v87_v32 }
  0xff   :  { %88 = vlog2.f32 %v33_v29 }
 0x100   :  { %v38_v43 = vadd.f32 %v35_v36, %v18_v10 }
 0x105   :  { %v89_v35 = vpop.eup %88 }
 0x106   :  { %v37_v37 = vmul.f32 0.6931472, %v89_v35  ;;  %v60_v38 = vpop.xlane.xlu2 %59 }
 0x107   :  { %v66_v40 = vmul.f32 0.003125, %v60_v38 }
 0x108   :  { %v39_v41 = vadd.f32 %v37_v37, %v21_v17 }
 0x109   :  { %v68_v44 = vadd.f32 %v66_v40, %v64_v39 }
 0x10a   :  { %v71_v45 = vsub.f32 %v39_v41, %v69_v42 }
 0x10b   :  { %v70_v46 = vsub.f32 %v38_v43, %v68_v44 }
 0x10c   :  { %74 = vst.msk [vmem:[%s134_s2 + $0x8] sm:$0xff] %vm72_vm3, %v71_v45 }
 0x10d   :  { %73 = vst.msk [vmem:[%s134_s2] sm:$0xff] %vm72_vm3, %v70_v46 }

</bundles_post_ra>
